<compile_context>
chip_gen: v7x
topology: tpu7x:2x2x1
jax: 0.10.0
libtpu: 0.0.40
codegen_flags: <defaults>
</compile_context>

<pallas_src>
import functools

import jax
import jax.numpy as jnp
from jax import lax
from jax.experimental import pallas as pl
from jax.experimental.pallas import tpu as pltpu

LANE = 128
SUBLANE = 8


def _kld_kernel(mu_ref, lv_ref, out_ref, acc_ref, *,
                tile_rows, full_rows, rem, need_mask):
    """Accumulate sum(logvar - mu^2 - exp(logvar)) into an (8,128) vector."""
    i = pl.program_id(0)

    @pl.when(i == 0)
    def _init():
        acc_ref[...] = jnp.zeros_like(acc_ref)

    mu = mu_ref[...].astype(jnp.float32)
    lv = lv_ref[...].astype(jnp.float32)
    # '+1' is hoisted to the wrapper epilogue (added there as `numel`),
    # saving one VALU op per vreg in the hot loop.
    term = lv - mu * mu - jnp.exp(lv)

    if need_mask:
        # Mask (a) rows past the true row count (ragged last grid block: VMEM
        # contents are garbage, exp() may be Inf/NaN -> select, never multiply)
        # and (b) lanes past the ragged last row.  Row-level compare avoids
        # int32 overflow for very large inputs.
        row = i * tile_rows + lax.broadcasted_iota(jnp.int32, (tile_rows, LANE), 0)
        valid = row < full_rows
        if rem:
            lane = lax.broadcasted_iota(jnp.int32, (tile_rows, LANE), 1)
            valid = valid | ((row == full_rows) & (lane < rem))
        term = jnp.where(valid, term, 0.0)

    # (tr,128)->(tr//8,8,128) preserves the native vreg tile; the reduce over
    # the leading axis is pure VPU vreg adds (no XLU / scalar work per step).
    acc_ref[...] += jnp.sum(term.reshape(-1, SUBLANE, LANE), axis=0)

    @pl.when(i == pl.num_programs(0) - 1)
    def _finalize():
        out_ref[...] = acc_ref[...]


def kl_div_loss(mu, logvar, lambda_value=0.1, *,
                tile_rows=4096, min_pallas_elems=1 << 19):
    assert mu.shape == logvar.shape
    numel = mu.size

    # Small-input fast path: kernel launch + separate reduce cost far more than
    # the work itself for typical VAE-latent sizes.
    if numel < max(min_pallas_elems, 16 * LANE):
        mu32 = mu.astype(jnp.float32)
        lv32 = logvar.astype(jnp.float32)
        kld = -0.5 * jnp.sum(1.0 + lv32 - mu32 * mu32 - jnp.exp(lv32))
        return lambda_value * (kld / numel)

    full_rows, rem = divmod(numel, LANE)
    rows_total = full_rows + (1 if rem else 0)

    mu_f = mu.reshape(-1)
    lv_f = logvar.reshape(-1)
    if rem:
        # Rare path (numel not a multiple of 128): pad only to the next lane
        # boundary so the (rows, 128) reshape is legal.  Ragged grid blocks
        # are handled by in-kernel masking; no tile-granularity padding.
        pad = rows_total * LANE - numel
        mu_f = jnp.pad(mu_f, (0, pad))
        lv_f = jnp.pad(lv_f, (0, pad))

    mu2 = mu_f.reshape(rows_total, LANE)
    lv2 = lv_f.reshape(rows_total, LANE)

    # Tile: 4096 rows f32 -> 2 MiB per input block, 8 MiB double-buffered
    # (under v5e's 16 MiB scoped-VMEM default).  Multiple of 16 rows for safe
    # sublane packing with bf16 inputs.
    tr = min(tile_rows, rows_total)
    tr = max(16, (tr // 16) * 16)
    grid = pl.cdiv(rows_total, tr)
    need_mask = bool(rem) or (rows_total % tr != 0)

    kernel = functools.partial(
        _kld_kernel, tile_rows=tr, full_rows=full_rows, rem=rem,
        need_mask=need_mask)

    partial_vec = pl.pallas_call(
        kernel,
        out_shape=jax.ShapeDtypeStruct((SUBLANE, LANE), jnp.float32),
        grid_spec=pltpu.PrefetchScalarGridSpec(
            num_scalar_prefetch=0,
            grid=(grid,),
            in_specs=[
                pl.BlockSpec((tr, LANE), lambda i: (i, 0)),
                pl.BlockSpec((tr, LANE), lambda i: (i, 0)),
            ],
            out_specs=pl.BlockSpec((SUBLANE, LANE), lambda i: (0, 0)),
            scratch_shapes=[pltpu.VMEM((SUBLANE, LANE), jnp.float32)],
        ),
        compiler_params=pltpu.CompilerParams(
            dimension_semantics=("arbitrary",),
        ),
    )(mu2, lv2)

    # Single cross-lane reduce + scalar epilogue, once, outside the kernel.
    # The hoisted '+1' contributes exactly `numel`.
    total = numel + jnp.sum(partial_vec)
    return (-0.5 * float(lambda_value) / numel) * total


def kl_div_loss_ref(mu, logvar, lambda_value=0.1):
    kld = -0.5 * jnp.sum(1.0 + logvar - mu ** 2 - jnp.exp(logvar))
    kld = kld / mu.size
    return lambda_value * kld


if __name__ == "__main__":
    key = jax.random.PRNGKey(0)
    k1, k2, k3, k4, k5, k6 = jax.random.split(key, 6)

    # 1) VAE-latent-like small shape -> fast path (plain jnp).
    shape = (2, 4, 16, 16)
    mu = jax.random.normal(k1, shape, dtype=jnp.float32)
    logvar = 0.1 * jax.random.normal(k2, shape, dtype=jnp.float32)
    ref = kl_div_loss_ref(mu, logvar, 0.1)
    out = jax.block_until_ready(kl_div_loss(mu, logvar, lambda_value=0.1))
    assert jnp.allclose(out, ref, rtol=1e-5, atol=1e-6), (out, ref)

    # 2) Same shape forced through the Pallas kernel (128-aligned, one step).
    out2 = jax.block_until_ready(
        kl_div_loss(mu, logvar, lambda_value=0.1, min_pallas_elems=0))
    assert jnp.allclose(out2, ref, rtol=1e-5, atol=1e-6), (out2, ref)

    # 3) Ragged size (not a multiple of 128) + ragged grid -> in-kernel masking.
    shape3 = (7, 333, 65)  # 151515 elements
    mu3 = jax.random.normal(k3, shape3, dtype=jnp.float32)
    lv3 = 0.1 * jax.random.normal(k4, shape3, dtype=jnp.float32)
    ref3 = kl_div_loss_ref(mu3, lv3, 0.1)
    out3 = jax.block_until_ready(
        kl_div_loss(mu3, lv3, lambda_value=0.1, tile_rows=256,
                    min_pallas_elems=0))
    assert jnp.allclose(out3, ref3, rtol=1e-4, atol=1e-5), (out3, ref3)

    # 4) bf16 inputs, multi-step accumulation, no masking (aligned).
    shape4 = (4, 64, 128)
    mu4 = jax.random.normal(k5, shape4, dtype=jnp.float32).astype(jnp.bfloat16)
    lv4 = (0.1 * jax.random.normal(k6, shape4, jnp.float32)).astype(jnp.bfloat16)
    ref4 = kl_div_loss_ref(mu4.astype(jnp.float32), lv4.astype(jnp.float32), 0.1)
    out4 = jax.block_until_ready(
        kl_div_loss(mu4, lv4, lambda_value=0.1, tile_rows=64,
                    min_pallas_elems=0))
    assert jnp.allclose(out4, ref4, rtol=1e-3, atol=1e-4), (out4, ref4)

    print("KERNEL_OK")
</pallas_src>

<mosaic_0001>
module attributes {stable_mosaic.version = 11 : i64} {
  func.func @_kld_kernel(%arg0: i32, %arg1: memref<16x128xf32, #tpu.memory_space<vmem>>, %arg2: memref<16x128xf32, #tpu.memory_space<vmem>>, %arg3: memref<8x128xf32, #tpu.memory_space<vmem>>, %arg4: memref<8x128xf32, #tpu.memory_space<vmem>>) attributes {dimension_semantics = [#tpu.dimension_semantics<arbitrary>], iteration_bounds = array<i64: 1>, scalar_prefetch = 0 : i64, scratch_operands = 1 : i64, tpu.core_type = #tpu.core_type<tc>, window_params = [{transform_indices = @transform_0, window_bounds = array<i64: 16, 128>}, {transform_indices = @transform_1, window_bounds = array<i64: 16, 128>}, {pipeline_mode = #tpu.pipeline_mode<synchronous>, transform_indices = @transform_2, window_bounds = array<i64: 8, 128>}]} {
    %c0_i32 = arith.constant 0 : i32
    %0 = arith.cmpi eq, %arg0, %c0_i32 : i32
    %1 = arith.extui %0 : i1 to i32
    %c0_i32_0 = arith.constant 0 : i32
    %2 = arith.cmpi ne, %1, %c0_i32_0 : i32
    scf.if %2 {
      %cst_10 = arith.constant 0.000000e+00 : f32
      %17 = vector.broadcast %cst_10 : f32 to vector<8x128xf32>
      %c0_11 = arith.constant 0 : index
      %c0_12 = arith.constant 0 : index
      %18 = vector.load %arg4[%c0_11, %c0_12] : memref<8x128xf32, #tpu.memory_space<vmem>>, vector<8x128xf32>
      tpu.vector_store %arg4[%c0_11, %c0_12], %17 {strides = array<i32>} : memref<8x128xf32, #tpu.memory_space<vmem>>, vector<8x128xf32>,
    } else {
    }
    %c0 = arith.constant 0 : index
    %c0_1 = arith.constant 0 : index
    %3 = vector.load %arg1[%c0, %c0_1] : memref<16x128xf32, #tpu.memory_space<vmem>>, vector<16x128xf32>
    %c0_2 = arith.constant 0 : index
    %c0_3 = arith.constant 0 : index
    %4 = vector.load %arg2[%c0_2, %c0_3] : memref<16x128xf32, #tpu.memory_space<vmem>>, vector<16x128xf32>
    %5 = arith.mulf %3, %3 : vector<16x128xf32>
    %6 = arith.subf %4, %5 : vector<16x128xf32>
    %7 = math.exp %4 : vector<16x128xf32>
    %8 = arith.subf %6, %7 : vector<16x128xf32>
    %c0_4 = arith.constant 0 : index
    %c0_5 = arith.constant 0 : index
    %9 = vector.load %arg4[%c0_4, %c0_5] : memref<8x128xf32, #tpu.memory_space<vmem>>, vector<8x128xf32>
    %10 = vector.shape_cast %8 : vector<16x128xf32> to vector<2x8x128xf32>
    %cst = arith.constant dense<0.000000e+00> : vector<8x128xf32>
    %11 = vector.multi_reduction <add>, %10, %cst [0] : vector<2x8x128xf32> to vector<8x128xf32>
    %12 = arith.addf %9, %11 : vector<8x128xf32>
    %c0_6 = arith.constant 0 : index
    %c0_7 = arith.constant 0 : index
    %13 = vector.load %arg4[%c0_6, %c0_7] : memref<8x128xf32, #tpu.memory_space<vmem>>, vector<8x128xf32>
    tpu.vector_store %arg4[%c0_6, %c0_7], %12 {strides = array<i32>} : memref<8x128xf32, #tpu.memory_space<vmem>>, vector<8x128xf32>,
    %c0_i32_8 = arith.constant 0 : i32
    %14 = arith.cmpi eq, %arg0, %c0_i32_8 : i32
    %15 = arith.extui %14 : i1 to i32
    %c0_i32_9 = arith.constant 0 : i32
    %16 = arith.cmpi ne, %15, %c0_i32_9 : i32
    scf.if %16 {
      %c0_10 = arith.constant 0 : index
      %c0_11 = arith.constant 0 : index
      %17 = vector.load %arg4[%c0_10, %c0_11] : memref<8x128xf32, #tpu.memory_space<vmem>>, vector<8x128xf32>
      %c0_12 = arith.constant 0 : index
      %c0_13 = arith.constant 0 : index
      %18 = vector.load %arg3[%c0_12, %c0_13] : memref<8x128xf32, #tpu.memory_space<vmem>>, vector<8x128xf32>
      tpu.vector_store %arg3[%c0_12, %c0_13], %17 {strides = array<i32>} : memref<8x128xf32, #tpu.memory_space<vmem>>, vector<8x128xf32>,
    } else {
    }
    return
  }
  func.func @transform_0(%arg0: i32) -> (i32, i32) {
    %c0_i32 = arith.constant 0 : i32
    %c0_i32_0 = arith.constant 0 : i32
    return %arg0, %c0_i32 : i32, i32
  }
  func.func @transform_1(%arg0: i32) -> (i32, i32) {
    %c0_i32 = arith.constant 0 : i32
    %c0_i32_0 = arith.constant 0 : i32
    return %arg0, %c0_i32 : i32, i32
  }
  func.func @transform_2(%arg0: i32) -> (i32, i32) {
    %c0_i32 = arith.constant 0 : i32
    %c0_i32_0 = arith.constant 0 : i32
    %c0_i32_1 = arith.constant 0 : i32
    return %c0_i32, %c0_i32_0 : i32, i32
  }
}

</mosaic_0001>

<bundles_post_ra>
// kernel: tpu_custom_call.1
= control target key start
LH: loop header
LB: loop body
LE: loop exit
PB: predicated region body
PF: predicated region fallthrough
CT: control target
= control target key end

     0   :  { %7 = vsyncpa [#allocation4], 0  ;;  %s221_s0 = inlined_call_operand.hbm [shape: f32[16,128], index: 0, kind: input, shape index: {}]   ;;  %s222_s1 = inlined_call_operand.hbm [shape: f32[16,128], index: 1, kind: input, shape index: {}]   ;;  %s223_s2 = inlined_call_operand.hbm [shape: f32[8,128], index: 2, kind: output, shape index: {}]  }
   0x1   :  { %8 = vsyncpa [#allocation7], 0 }
   0x2   :  { %9 = vsyncpa [#allocation5], 0  ;;  %s165_s9 = smov [#allocation3]   ;;  %s93_s13 = scalar_lea.hbm %s221_s0, 256 }
   0x3   :  { %s15_s10 = sshll.u32 %s165_s9, 4  ;;  %p94_p0 = scmp.ne.s32.totalorder %s221_s0, %s93_s13  ;;  %s16_s10 = int_to_ptr.vmem [resolvable:$true] %s15_s10 }
   0x4   :  { %p97_p1 = scmp.lt.u32.totalorder %s93_s13, %s221_s0 }
   0x6   :  { %p99_p2 = pnand %p97_p1, %p94_p0 }
   0x8   :  { %102 = shalt.err (!%p99_p2)
}
   0x9   :  { %s103_s18 = scalar_lea.vmem %s16_s10, 256  ;;  %p108_p4 = scmp.lt.s32.totalorder %s16_s10, %s16_s10 }
   0xa   :  { %p104_p3 = scmp.ne.s32.totalorder %s16_s10, %s103_s18  ;;  %p109_p5 = scmp.lt.s32.totalorder %s103_s18, %s103_s18 }
   0xc   :  { %p110_p6 = por %p109_p5, %p108_p4 }
   0xe   :  { %p111_p7 = pnand %p110_p6, %p104_p3 }
  0x10   :  { %114 = shalt.err (!%p111_p7)
}
  0x11   :  { %s166_s19 = smov 128   ;;  %s167_s20 = smov 8  }
  0x12   :  { %21 = dma.hbm_to_vmem [thread:$0]  %s221_s0, 256, %s16_s10, [#allocation4], %s166_s19, %s166_s19, %s167_s20  }
  0x13   :  { %s168_s23 = smov [#allocation6]   ;;  %s115_s27 = scalar_lea.hbm %s222_s1, 256 }
  0x14   :  { %s27_s24 = sshll.u32 %s168_s23, 4  ;;  %p116_p8 = scmp.ne.s32.totalorder %s222_s1, %s115_s27  ;;  %s28_s24 = int_to_ptr.vmem [resolvable:$true] %s27_s24 }
  0x15   :  { %p119_p9 = scmp.lt.u32.totalorder %s115_s27, %s222_s1 }
  0x17   :  { %p121_p10 = pnand %p119_p9, %p116_p8 }
  0x19   :  { %124 = shalt.err (!%p121_p10)
}
  0x1a   :  { %s125_s4 = scalar_lea.vmem %s28_s24, 256  ;;  %p130_p12 = scmp.lt.s32.totalorder %s28_s24, %s28_s24 }
  0x1b   :  { %p126_p11 = scmp.ne.s32.totalorder %s28_s24, %s125_s4  ;;  %p131_p13 = scmp.lt.s32.totalorder %s125_s4, %s125_s4 }
  0x1d   :  { %p132_p0 = por %p131_p13, %p130_p12 }
  0x1f   :  { %p133_p1 = pnand %p132_p0, %p126_p11 }
  0x21   :  { %136 = shalt.err (!%p133_p1)
}
  0x22   :  { %33 = dma.hbm_to_vmem [thread:$0]  %s222_s1, 256, %s28_s24, [#allocation7], %s166_s19, %s166_s19, %s167_s20  }
  0x23   :  { %159 = dma.done.wait [#allocation4], 256  }
  0x24   :  { %160 = vsyncadd [#allocation4], 4294967040 }
  0x25   :  { %161 = dma.done.wait [#allocation7], 256  }
  0x26   :  { %162 = vsyncadd [#allocation7], 4294967040  ;;  %v47_v0 = vld [vmem:[#allocation6] sm:$0xff]  ;;  %v48_v1 = vld [vmem:[#allocation6 + $0x8] sm:$0xff]  ;;  %s169_s1 = smov [#allocation8]  }
  0x27   :  { %v53_v2 = vmul.f32 1.442695, %v47_v0  ;;  %v55_v3 = vmul.f32 1.442695, %v48_v1  ;;  %v45_v4 = vld [vmem:[#allocation3] sm:$0xff]  ;;  %v46_v5 = vld [vmem:[#allocation3 + $0x8] sm:$0xff] }
  0x28   :  { %v49_v6 = vmul.f32 %v45_v4, %v45_v4  ;;  %v50_v7 = vmul.f32 %v46_v5, %v46_v5  ;;  %s74_s6 = sshll.u32 %s169_s1, 4  ;;  %s75_s6 = int_to_ptr.vmem [resolvable:$true] %s74_s6 }
  0x29   :  { %89 = vpow2.f32 %v53_v2  ;;  %s137_s7 = scalar_lea.vmem %s75_s6, 128  ;;  %p142_p3 = scmp.lt.s32.totalorder %s75_s6, %s75_s6 }
  0x2a   :  { %91 = vpow2.f32 %v55_v3  ;;  %v51_v8 = vsub.f32 %v47_v0, %v49_v6  ;;  %v52_v9 = vsub.f32 %v48_v1, %v50_v7  ;;  %p138_p2 = scmp.ne.s32.totalorder %s75_s6, %s137_s7  ;;  %p143_p4 = scmp.lt.s32.totalorder %s137_s7, %s137_s7 }
  0x2c   :  { %p144_p5 = por %p143_p4, %p142_p3 }
  0x2e   :  { %p145_p6 = pnand %p144_p5, %p138_p2 }
  0x33   :  { %v90_v10 = vpop.eup %89 }
  0x34   :  { %v92_v11 = vpop.eup %91  ;;  %v57_v12 = vsub.f32 %v51_v8, %v90_v10 }
  0x35   :  { %v58_v13 = vsub.f32 %v52_v9, %v92_v11 }
  0x37   :  { %v60_v14 = vadd.f32 %v58_v13, %v57_v12 }
  0x39   :  { %67 = vst [vmem:[#allocation8] sm:$0xff] %v60_v14 }
  0x3a   :  { %148 = shalt.err (!%p145_p6)
}
  0x3b   :  { %s149_s10 = scalar_lea.hbm %s223_s2, 128 }
  0x3c   :  { %p150_p7 = scmp.ne.s32.totalorder %s223_s2, %s149_s10  ;;  %p153_p8 = scmp.lt.u32.totalorder %s149_s10, %s223_s2 }
  0x3e   :  { %p155_p9 = pnand %p153_p8, %p150_p7 }
  0x40   :  { %158 = shalt.err (!%p155_p9)
}
  0x41   :  { %77 = dma.vmem_to_hbm [thread:$0]  %s75_s6, 128, %s223_s2, [#allocation5]  }
  0x42   :  { %163 = dma.done.wait [#allocation5], 128  }
  0x43   :  { %164 = vsyncadd [#allocation5], 4294967168 }
  0x44   :  { %81 = vsyncpa [#allocation4], 1 }
  0x45   :  { %82 = vsyncpa [#allocation7], 1 }
  0x46   :  { %83 = vsyncpa [#allocation5], 1 }

</bundles_post_ra>
